<compile_context>
chip_gen: v5e
topology: v5e:2x2
jax: 0.10.0
libtpu: 0.0.40
codegen_flags: <defaults>
</compile_context>

<pallas_src>
import math
from functools import partial

import jax
import jax.numpy as jnp
from jax.experimental import pallas as pl
from jax.experimental.pallas import tpu as pltpu

_LANES = 128
_DEFAULT_TILE_ROWS = 1024  # 2 * 1024 * 128 * 4 B = 1 MiB per block


def _phase_shift_kernel(cs_ref, x_ref, o_ref):
    # cs_ref: SMEM (2,) f32           -> [cos(phi), sin(phi)]
    # x_ref : VMEM (2, tile_rows, 128) -> [real plane; imag plane]
    # o_ref : VMEM (2, tile_rows, 128) -> rotated [real plane; imag plane]
    c = cs_ref[0]
    s = cs_ref[1]
    xr = x_ref[0, :, :]
    xi = x_ref[1, :, :]
    o_ref[0, :, :] = xr * c - xi * s
    o_ref[1, :, :] = xr * s + xi * c


def _phase_shift_planes(planes: jax.Array, cs: jax.Array, tile_rows: int) -> jax.Array:
    """planes: (2, rows, 128) f32, cs: (2,) f32 -> (2, rows, 128) f32."""
    rows = planes.shape[1]
    tile_rows = min(int(tile_rows), rows)
    if tile_rows != rows:
        # Block's second-to-last dim must be a multiple of 8 (or the full dim).
        tile_rows = max(8, (tile_rows // 8) * 8)
    grid = (pl.cdiv(rows, tile_rows),)
    return pl.pallas_call(
        _phase_shift_kernel,
        out_shape=jax.ShapeDtypeStruct(planes.shape, jnp.float32),
        grid=grid,
        in_specs=[
            pl.BlockSpec(memory_space=pltpu.MemorySpace.SMEM),         # cos/sin
            pl.BlockSpec((2, tile_rows, _LANES), lambda i: (0, i, 0)),  # planes
        ],
        out_specs=pl.BlockSpec((2, tile_rows, _LANES), lambda i: (0, i, 0)),
        compiler_params=pltpu.CompilerParams(
            dimension_semantics=("parallel",),
        ),
    )(cs, planes)


@partial(jax.jit, static_argnames=("tile_rows",))
def _apply_phase_shift(x: jax.Array, phi: jax.Array,
                       tile_rows: int = _DEFAULT_TILE_ROWS) -> jax.Array:
    """x: (N,) complex64, phi: scalar f32 -> x * exp(i*phi) as complex64."""
    n = x.shape[0]
    rows = pl.cdiv(n, _LANES)
    pad = rows * _LANES - n

    cs = jnp.stack([jnp.cos(phi), jnp.sin(phi)]).astype(jnp.float32)

    # One fused XLA pass: read x once, write the dense (2, rows, 128) slab once.
    xr = jnp.real(x)
    xi = jnp.imag(x)
    if pad:
        xr = jnp.pad(xr, (0, pad))
        xi = jnp.pad(xi, (0, pad))
    planes = jnp.stack(
        [xr.reshape(rows, _LANES), xi.reshape(rows, _LANES)], axis=0
    ).astype(jnp.float32)

    out = _phase_shift_planes(planes, cs, tile_rows)

    # One fused pass back to interleaved complex64.
    yr = out[0].reshape(rows * _LANES)[:n]
    yi = out[1].reshape(rows * _LANES)[:n]
    return jax.lax.complex(yr, yi)


class ApplyPhaseShift:
    """JAX/Pallas port of sigkit.transforms.phase_shift.ApplyPhaseShift.

    phase_offset: single number (fixed phase, radians) or (min, max) tuple
    (uniform random phase drawn per call from the provided PRNG key).
    """

    def __init__(self, phase_offset):
        if isinstance(phase_offset, (int, float)):
            self.min_phi = float(phase_offset)
            self.max_phi = float(phase_offset)
        elif (
            isinstance(phase_offset, (tuple, list))
            and len(phase_offset) == 2
            and all(isinstance(p, (int, float)) for p in phase_offset)
        ):
            self.min_phi = float(phase_offset[0])
            self.max_phi = float(phase_offset[1])
        else:
            raise ValueError(
                "ApplyPhaseShift: phase_offset must be a number or a pair of "
                f"numbers, got {phase_offset!r}"
            )

    def __call__(self, x: jax.Array, key: jax.Array | None = None,
                 tile_rows: int = _DEFAULT_TILE_ROWS) -> jax.Array:
        if x.dtype != jnp.complex64 or x.ndim != 1:
            raise ValueError(
                "ApplyPhaseShift expects a 1D complex64 array, got "
                f"shape={x.shape}, dtype={x.dtype}"
            )
        if self.min_phi == self.max_phi:
            phi = jnp.float32(self.min_phi)
        else:
            # NOTE: with key=None the "random" phase is deterministic
            # (PRNGKey(0)); pass a fresh key per call for true randomness.
            if key is None:
                key = jax.random.PRNGKey(0)
            r = jax.random.uniform(key, (), dtype=jnp.float32)
            phi = jnp.float32(self.min_phi) + jnp.float32(
                self.max_phi - self.min_phi
            ) * r
        # TODO(synk): for many small signals, batch them as (B, N) and extend
        # the grid over B instead of launching one kernel per 1D signal.
        return _apply_phase_shift(x, phi, tile_rows=tile_rows)


if __name__ == "__main__":
    key = jax.random.PRNGKey(0)
    k1, k2, k3, k4 = jax.random.split(key, 4)

    # --- Test 1: fixed phase, N multiple of 128 (single grid step) ---
    N1 = 4096
    x1 = (
        jax.random.normal(k1, (N1,), dtype=jnp.float32)
        + 1j * jax.random.normal(k2, (N1,), dtype=jnp.float32)
    ).astype(jnp.complex64)
    phi_const = math.pi / 3.0
    t1 = ApplyPhaseShift(phi_const)
    y1 = jax.block_until_ready(t1(x1))
    y1_ref = x1 * jnp.exp(1j * jnp.float32(phi_const))
    assert y1.shape == x1.shape and y1.dtype == jnp.complex64
    assert float(jnp.max(jnp.abs(y1 - y1_ref))) < 1e-5

    # --- Test 2: random phase branch + multi-tile grid with a partial edge
    #             block (rows=10, tile_rows=8 -> grid=(2,)) ---
    N2 = 1280
    x2 = (
        jax.random.normal(k3, (N2,), dtype=jnp.float32)
        + 1j * jax.random.normal(k4, (N2,), dtype=jnp.float32)
    ).astype(jnp.complex64)
    t2 = ApplyPhaseShift((-math.pi, math.pi))
    kphi = jax.random.PRNGKey(42)
    y2 = jax.block_until_ready(t2(x2, key=kphi, tile_rows=8))
    r = jax.random.uniform(kphi, (), dtype=jnp.float32)
    phi2 = jnp.float32(-math.pi) + jnp.float32(2.0 * math.pi) * r
    y2_ref = x2 * jnp.exp(1j * phi2)
    assert y2.shape == x2.shape and y2.dtype == jnp.complex64
    assert float(jnp.max(jnp.abs(y2 - y2_ref))) < 1e-5

    print("KERNEL_OK")
</pallas_src>

<mosaic_0001>
module attributes {stable_mosaic.version = 11 : i64} {
  func.func @_phase_shift_kernel(%arg0: i32, %arg1: memref<2xf32, #tpu.memory_space<smem>>, %arg2: memref<2x32x128xf32, #tpu.memory_space<vmem>>, %arg3: memref<2x32x128xf32, #tpu.memory_space<vmem>>) attributes {dimension_semantics = [#tpu.dimension_semantics<parallel>], iteration_bounds = array<i64: 1>, scalar_prefetch = 0 : i64, scratch_operands = 0 : i64, tpu.core_type = #tpu.core_type<tc>, window_params = [{transform_indices = @transform_0, window_bounds = array<i64: 2>}, {transform_indices = @transform_1, window_bounds = array<i64: 2, 32, 128>}, {transform_indices = @transform_2, window_bounds = array<i64: 2, 32, 128>}]} {
    %c0 = arith.constant 0 : index
    %0 = memref.load %arg1[%c0] : memref<2xf32, #tpu.memory_space<smem>>
    %c1 = arith.constant 1 : index
    %1 = memref.load %arg1[%c1] : memref<2xf32, #tpu.memory_space<smem>>
    %c0_0 = arith.constant 0 : index
    %c0_1 = arith.constant 0 : index
    %c0_2 = arith.constant 0 : index
    %2 = vector.load %arg2[%c0_0, %c0_1, %c0_2] : memref<2x32x128xf32, #tpu.memory_space<vmem>>, vector<1x32x128xf32>
    %3 = vector.shape_cast %2 : vector<1x32x128xf32> to vector<32x128xf32>
    %c1_3 = arith.constant 1 : index
    %c0_4 = arith.constant 0 : index
    %c0_5 = arith.constant 0 : index
    %4 = vector.load %arg2[%c1_3, %c0_4, %c0_5] : memref<2x32x128xf32, #tpu.memory_space<vmem>>, vector<1x32x128xf32>
    %5 = vector.shape_cast %4 : vector<1x32x128xf32> to vector<32x128xf32>
    %6 = vector.broadcast %0 : f32 to vector<32x128xf32>
    %7 = arith.mulf %3, %6 : vector<32x128xf32>
    %8 = vector.broadcast %1 : f32 to vector<32x128xf32>
    %9 = arith.mulf %5, %8 : vector<32x128xf32>
    %10 = arith.subf %7, %9 : vector<32x128xf32>
    %c0_6 = arith.constant 0 : index
    %c0_7 = arith.constant 0 : index
    %c0_8 = arith.constant 0 : index
    %11 = vector.load %arg3[%c0_6, %c0_7, %c0_8] : memref<2x32x128xf32, #tpu.memory_space<vmem>>, vector<1x32x128xf32>
    %12 = vector.shape_cast %11 : vector<1x32x128xf32> to vector<32x128xf32>
    %13 = vector.shape_cast %10 : vector<32x128xf32> to vector<1x32x128xf32>
    tpu.vector_store %arg3[%c0_6, %c0_7, %c0_8], %13 {strides = array<i32>} : memref<2x32x128xf32, #tpu.memory_space<vmem>>, vector<1x32x128xf32>,
    %14 = vector.broadcast %1 : f32 to vector<32x128xf32>
    %15 = arith.mulf %3, %14 : vector<32x128xf32>
    %16 = vector.broadcast %0 : f32 to vector<32x128xf32>
    %17 = arith.mulf %5, %16 : vector<32x128xf32>
    %18 = arith.addf %15, %17 : vector<32x128xf32>
    %c1_9 = arith.constant 1 : index
    %c0_10 = arith.constant 0 : index
    %c0_11 = arith.constant 0 : index
    %19 = vector.load %arg3[%c1_9, %c0_10, %c0_11] : memref<2x32x128xf32, #tpu.memory_space<vmem>>, vector<1x32x128xf32>
    %20 = vector.shape_cast %19 : vector<1x32x128xf32> to vector<32x128xf32>
    %21 = vector.shape_cast %18 : vector<32x128xf32> to vector<1x32x128xf32>
    tpu.vector_store %arg3[%c1_9, %c0_10, %c0_11], %21 {strides = array<i32>} : memref<2x32x128xf32, #tpu.memory_space<vmem>>, vector<1x32x128xf32>,
    return
  }
  func.func @transform_0(%arg0: i32) -> i32 {
    %c0_i32 = arith.constant 0 : i32
    %c0_i32_0 = arith.constant 0 : i32
    return %c0_i32 : i32
  }
  func.func @transform_1(%arg0: i32) -> (i32, i32, i32) {
    %c0_i32 = arith.constant 0 : i32
    %c0_i32_0 = arith.constant 0 : i32
    %c0_i32_1 = arith.constant 0 : i32
    return %c0_i32, %arg0, %c0_i32_0 : i32, i32, i32
  }
  func.func @transform_2(%arg0: i32) -> (i32, i32, i32) {
    %c0_i32 = arith.constant 0 : i32
    %c0_i32_0 = arith.constant 0 : i32
    %c0_i32_1 = arith.constant 0 : i32
    return %c0_i32, %arg0, %c0_i32_0 : i32, i32, i32
  }
}

</mosaic_0001>

<bundles_post_ra>
// kernel: custom-call
= control target key start
LH: loop header
LB: loop body
LE: loop exit
PB: predicated region body
PF: predicated region fallthrough
CT: control target
= control target key end

     0   :  { %2 = vsyncpa [#allocation0], 0  ;;  %s55_s0 = inlined_call_operand.hbm [shape: c64[4096], index: 0, kind: input, shape index: {}]   ;;  %s56_s1 = inlined_call_operand.vmem [shape: f32[4096], index: 1, kind: output, shape index: {}]  }
   0x1   :  { %s4_s8 = sshll.u32 %s55_s0, 4  ;;  %s6_s11 = sshll.u32 %s56_s1, 4  ;;  %s5_s8 = int_to_ptr.hbm [resolvable:$true] %s4_s8  ;;  %s7_s11 = int_to_ptr.vmem [resolvable:$true] %s6_s11 }
   0x2   :  { %9 = dma.hbm_to_vmem [thread:$0]  %s5_s8, 512, %s7_s11, [#allocation0] }
   0x3   :  { %37 = dma.done.wait [#allocation0], 512  }
   0x4   :  { %38 = vsyncadd [#allocation0], 4294966784 }
   0x5   :  { %12 = vsyncpa [#allocation0], 1 }

// kernel: custom-call.1
= control target key start
LH: loop header
LB: loop body
LE: loop exit
PB: predicated region body
PF: predicated region fallthrough
CT: control target
= control target key end

     0   :  { %s56_s0 = inlined_call_operand.hbm [shape: c64[4096], index: 0, kind: input, shape index: {}]   ;;  %s57_s1 = inlined_call_operand.vmem [shape: f32[4096], index: 1, kind: output, shape index: {}]  }
   0x1   :  { %s2_s8 = scalar_lea.hbm %s56_s0, 32 }
   0x2   :  { %3 = vsyncpa [#allocation0], 0  ;;  %s5_s9 = sshll.u32 %s2_s8, 4  ;;  %s7_s12 = sshll.u32 %s57_s1, 4  ;;  %s6_s9 = int_to_ptr.hbm [resolvable:$true] %s5_s9  ;;  %s8_s12 = int_to_ptr.vmem [resolvable:$true] %s7_s12 }
   0x3   :  { %10 = dma.hbm_to_vmem [thread:$0]  %s6_s9, 512, %s8_s12, [#allocation0] }
   0x4   :  { %38 = dma.done.wait [#allocation0], 512  }
   0x5   :  { %39 = vsyncadd [#allocation0], 4294966784 }
   0x6   :  { %13 = vsyncpa [#allocation0], 1 }

// kernel: custom-call.2
= control target key start
LH: loop header
LB: loop body
LE: loop exit
PB: predicated region body
PF: predicated region fallthrough
CT: control target
= control target key end

     0   :  { %s105_s0 = inlined_call_operand.vmem [shape: f32[4096], index: 0, kind: input, shape index: {}]   ;;  %s106_s1 = inlined_call_operand.vmem [shape: f32[4096], index: 1, kind: input, shape index: {}]   ;;  %s107_s2 = inlined_call_operand.hbm [shape: c64[4096], index: 2, kind: output, shape index: {}]  }
   0x1   :  { %s3_s11 = scalar_lea.hbm %s107_s2, 32 }
   0x2   :  { %4 = vsyncpa [#allocation0], 0  ;;  %s6_s14 = sshll.u32 %s105_s0, 4  ;;  %s8_s17 = sshll.u32 %s107_s2, 4  ;;  %s7_s14 = int_to_ptr.vmem [resolvable:$true] %s6_s14  ;;  %s9_s17 = int_to_ptr.hbm [resolvable:$true] %s8_s17 }
   0x3   :  { %11 = dma.vmem_to_hbm [thread:$0]  %s7_s14, 512, %s9_s17, [#allocation0] }
   0x4   :  { %74 = dma.done.wait [#allocation0], 512  }
   0x5   :  { %75 = vsyncadd [#allocation0], 4294966784 }
   0x6   :  { %14 = vsyncpa [#allocation0], 1 }
   0x7   :  { %15 = vsyncpa [#allocation1], 0  ;;  %s17_s20 = sshll.u32 %s106_s1, 4  ;;  %s19_s21 = sshll.u32 %s3_s11, 4  ;;  %s18_s20 = int_to_ptr.vmem [resolvable:$true] %s17_s20  ;;  %s20_s21 = int_to_ptr.hbm [resolvable:$true] %s19_s21 }
   0x8   :  { %22 = dma.vmem_to_hbm [thread:$0]  %s18_s20, 512, %s20_s21, [#allocation1] }
   0x9   :  { %76 = dma.done.wait [#allocation1], 512  }
   0xa   :  { %77 = vsyncadd [#allocation1], 4294966784 }
   0xb   :  { %25 = vsyncpa [#allocation1], 1 }

// kernel: _apply_phase_shift.1
= control target key start
LH: loop header
LB: loop body
LE: loop exit
PB: predicated region body
PF: predicated region fallthrough
CT: control target
= control target key end

     0   :  { %7 = vsyncpa [#allocation3], 0  ;;  %s99_s12 = smov [#allocation2]   ;;  %s166_s0 = inlined_call_operand.vmem [shape: f32[2], index: 0, kind: input, shape index: {}]   ;;  %s167_s1 = inlined_call_operand.vmem [shape: f32[2,32,128], index: 1, kind: input, shape index: {}]   ;;  %s168_s2 = inlined_call_operand.vmem [shape: f32[2,32,128], index: 2, kind: output, shape index: {}]  }
   0x1   :  { %s13_s11 = sshll.u32 %s166_s0, 4  ;;  %s14_s11 = int_to_ptr.vmem [resolvable:$true] %s13_s11 }
   0x2   :  { %16 = dma.vmem_to_smem %s14_s11, 16, %s99_s12, [#allocation3]  }
   0x3   :  { %97 = dma.done.wait [#allocation3], 16  }
   0x4   :  { %98 = vsyncadd [#allocation3], 4294967280 }
   0x5   :  { %23 = sfence }
   0x6   :  { %s24_s13 = sld [smem:[#allocation2]]  ;;  %v26_v0 = vld [vmem:[%s167_s1] sm:$0xff]  ;;  %v27_v2 = vld [vmem:[%s167_s1 + $0x8] sm:$0xff]  ;;  %v28_v3 = vld [vmem:[%s167_s1 + $0x10] sm:$0xff] }
   0x7   :  { %s75_s14 = sld [smem:[#allocation2 + $0x1]]  ;;  %v76_v1 = vld [vmem:[%s167_s1 + $0x20] sm:$0xff]  ;;  %v77_v4 = vld [vmem:[%s167_s1 + $0x28] sm:$0xff]  ;;  %v78_v5 = vld [vmem:[%s167_s1 + $0x30] sm:$0xff] }
   0x8   :  { %v29_v6 = vld [vmem:[%s167_s1 + $0x18] sm:$0xff] }
   0x9   :  { %v79_v8 = vld [vmem:[%s167_s1 + $0x38] sm:$0xff] }
   0xc   :  { %v35_v7 = vstv %s24_s13 }
   0xd   :  { %v36_v9 = vmul.f32 %v35_v7, %v26_v0  ;;  %v40_v10 = vstv %s75_s14  ;;  %v37_v11 = vmul.f32 %v35_v7, %v27_v2  ;;  %v38_v12 = vmul.f32 %v35_v7, %v28_v3 }
   0xe   :  { %v41_v13 = vmul.f32 %v76_v1, %v40_v10  ;;  %v42_v14 = vmul.f32 %v77_v4, %v40_v10  ;;  %v43_v15 = vmul.f32 %v78_v5, %v40_v10  ;;  %v39_v16 = vmul.f32 %v35_v7, %v29_v6 }
   0xf   :  { %v44_v17 = vmul.f32 %v79_v8, %v40_v10  ;;  %v53_v18 = vmul.f32 %v40_v10, %v26_v0  ;;  %v57_v19 = vmul.f32 %v76_v1, %v35_v7  ;;  %v54_v20 = vmul.f32 %v40_v10, %v27_v2 }
  0x10   :  { %v45_v21 = vsub.f32 %v36_v9, %v41_v13  ;;  %v46_v22 = vsub.f32 %v37_v11, %v42_v14  ;;  %v47_v23 = vsub.f32 %v38_v12, %v43_v15  ;;  %v58_v24 = vmul.f32 %v77_v4, %v35_v7 }
  0x11   :  { %v48_v25 = vsub.f32 %v39_v16, %v44_v17  ;;  %v55_v26 = vmul.f32 %v40_v10, %v28_v3  ;;  %v59_v27 = vmul.f32 %v78_v5, %v35_v7  ;;  %v61_v28 = vadd.f32 %v57_v19, %v53_v18 }
  0x12   :  { %49 = vst [vmem:[%s168_s2] sm:$0xff] %v45_v21  ;;  %v56_v29 = vmul.f32 %v40_v10, %v29_v6  ;;  %v60_v30 = vmul.f32 %v79_v8, %v35_v7  ;;  %v62_v31 = vadd.f32 %v58_v24, %v54_v20 }
  0x13   :  { %50 = vst [vmem:[%s168_s2 + $0x8] sm:$0xff] %v46_v22  ;;  %v63_v32 = vadd.f32 %v59_v27, %v55_v26 }
  0x14   :  { %51 = vst [vmem:[%s168_s2 + $0x10] sm:$0xff] %v47_v23  ;;  %v64_v33 = vadd.f32 %v60_v30, %v56_v29 }
  0x15   :  { %52 = vst [vmem:[%s168_s2 + $0x18] sm:$0xff] %v48_v25 }
  0x16   :  { %80 = vst [vmem:[%s168_s2 + $0x20] sm:$0xff] %v61_v28 }
  0x17   :  { %81 = vst [vmem:[%s168_s2 + $0x28] sm:$0xff] %v62_v31 }
  0x18   :  { %82 = vst [vmem:[%s168_s2 + $0x30] sm:$0xff] %v63_v32 }
  0x19   :  { %83 = vst [vmem:[%s168_s2 + $0x38] sm:$0xff] %v64_v33 }
  0x1a   :  { %74 = vsyncpa [#allocation3], 1 }

</bundles_post_ra>
